<compile_context>
chip_gen: v6e
topology: v6e:2x2x1
jax: 0.10.0
libtpu: 0.0.40
codegen_flags: <defaults>
</compile_context>

<pallas_src>
from functools import partial

import jax
import jax.numpy as jnp
from jax.experimental import pallas as pl
from jax.experimental.pallas import tpu as pltpu


# ----------------------------- kernels --------------------------------------

def _affine_kernel(scale_ref, shift_ref, x_ref, o_ref):
    # (TM, T) * (TM, 1) + (TM, 1): pure VPU work, lane-dense loads/stores.
    o_ref[...] = (x_ref[...] * scale_ref[...] + shift_ref[...]).astype(o_ref.dtype)


def _shift_kernel(shift_ref, x_ref, o_ref):
    o_ref[...] = (x_ref[...] + shift_ref[...]).astype(o_ref.dtype)


# ------------------------ generation-aware tiling ----------------------------

_BLOCK_BUDGET = {"v5e": 3 << 20, "v6e": 6 << 20, "v7x": 5 << 20}


def _tpu_generation():
    try:
        kind = jax.devices()[0].device_kind.lower()
    except Exception:
        return "unknown"
    if "v5" in kind:
        return "v5e"
    if "v6" in kind:
        return "v6e"
    if "v7" in kind or "7x" in kind:
        return "v7x"
    return "unknown"


def _choose_tiles(bc, hw, itemsize, max_block_bytes, row_unit):
    """Pick (TM, T) with TM a multiple of row_unit (or == bc) and T a multiple
    of 128 (or == hw), keeping TM*T*itemsize <= max_block_bytes."""
    # Row (sublane) axis.
    if bc <= row_unit or bc * 128 * itemsize <= max_block_bytes:
        tm = bc
    else:
        tm = max(row_unit,
                 (max_block_bytes // (128 * itemsize)) // row_unit * row_unit)
        tm = min(tm, (bc // row_unit) * row_unit)
    # Spatial (lane) axis.
    if hw <= 128:
        t = hw
    else:
        t_cap = max(128, (max_block_bytes // (tm * itemsize)) // 128 * 128)
        t = hw if t_cap >= hw else t_cap
    # Guarantee >= 2 grid steps where possible (v7x has 2 TensorCores).
    if (-(-bc // tm)) * (-(-hw // t)) == 1:
        if hw >= 256:
            t = max(128, (hw // 2) // 128 * 128)
        elif bc >= 2 * row_unit:
            tm = max(row_unit, (bc // 2) // row_unit * row_unit)
    return int(tm), int(t)


# ------------------------------ wrapper --------------------------------------

def featurewise_affine(x, noise_embed, weight, bias, *, use_affine_level):
    """x: (B, C, H, W) NCHW; noise_embed: (B, Cin);
    weight: (Nout, Cin) PyTorch Linear layout; bias: (Nout,)."""
    B, C, H, W = x.shape
    Nout = weight.shape[0]
    assert Nout == C * (1 + int(use_affine_level))
    HW = H * W
    BC = B * C
    itemsize = jnp.dtype(x.dtype).itemsize

    gen = _tpu_generation()

    # ---- hoisted Linear: one tiny XLA matmul with f32 accumulation ----------
    y = (jnp.dot(noise_embed.astype(jnp.float32),
                 weight.astype(jnp.float32).T,
                 preferred_element_type=jnp.float32)
         + bias.astype(jnp.float32))                       # (B, Nout)

    # bf16 params only where the VALUs natively support bf16 (v6e/v7x);
    # on v5e bf16 would be up-converted anyway, so keep f32 params.
    if x.dtype == jnp.bfloat16 and gen in ("v6e", "v7x"):
        param_dtype = jnp.bfloat16
    else:
        param_dtype = jnp.float32

    if use_affine_level:
        scale = (1.0 + y[:, :C]).reshape(BC, 1).astype(param_dtype)
        shift = y[:, C:].reshape(BC, 1).astype(param_dtype)
    else:
        shift = y.reshape(BC, 1).astype(param_dtype)

    # Sublane-dense layout: rows = (batch, channel), lanes = spatial.
    x_flat = x.reshape(BC, HW)

    budget = _BLOCK_BUDGET.get(gen, 2 << 20)
    row_unit = 8 * max(1, 4 // itemsize)                   # 8 f32, 16 bf16
    TM, T = _choose_tiles(BC, HW, itemsize, budget, row_unit)
    grid = (pl.cdiv(BC, TM), pl.cdiv(HW, T))

    x_spec = pl.BlockSpec((TM, T), lambda r, s: (r, s))
    vec_spec = pl.BlockSpec((TM, 1), lambda r, s: (r, 0))

    if use_affine_level:
        kernel = _affine_kernel
        in_specs = [vec_spec, vec_spec, x_spec]
        operands = (scale, shift, x_flat)
        x_arg_idx = 2
    else:
        kernel = _shift_kernel
        in_specs = [vec_spec, x_spec]
        operands = (shift, x_flat)
        x_arg_idx = 1

    # Double-buffered in + out blocks, plus a little margin.
    block_bytes = TM * T * itemsize
    vmem_limit = int(min(max(4 * block_bytes + (2 << 20), 16 << 20), 48 << 20))

    param_bytes = (1 + int(use_affine_level)) * BC * jnp.dtype(param_dtype).itemsize
    cost = pl.CostEstimate(
        flops=(2 if use_affine_level else 1) * BC * HW,
        transcendentals=0,
        bytes_accessed=2 * BC * HW * itemsize + param_bytes)

    out_flat = pl.pallas_call(
        kernel,
        out_shape=jax.ShapeDtypeStruct((BC, HW), x.dtype),
        grid=grid,
        in_specs=in_specs,
        out_specs=x_spec,
        input_output_aliases={x_arg_idx: 0},   # in-place scale-and-shift
        compiler_params=pltpu.CompilerParams(
            dimension_semantics=("parallel", "parallel"),
            vmem_limit_bytes=vmem_limit),
        cost_estimate=cost,
    )(*operands)

    return out_flat.reshape(B, C, H, W)


# ----------------------------- reference -------------------------------------

def _reference(x, noise_embed, weight, bias, *, use_affine_level):
    B = x.shape[0]
    y = noise_embed @ weight.T + bias
    if use_affine_level:
        y = y.reshape(B, -1, 1, 1)
        gamma, beta = jnp.split(y, 2, axis=1)
        return (1.0 + gamma) * x + beta
    return x + y.reshape(B, -1, 1, 1)


if __name__ == "__main__":
    key = jax.random.PRNGKey(0)
    B, Cin, C, H, W = 2, 32, 4, 16, 16

    k_x, k_n, k_w1, k_b1, k_w2, k_b2 = jax.random.split(key, 6)
    x = jax.random.normal(k_x, (B, C, H, W), dtype=jnp.float32)
    noise_embed = jax.random.normal(k_n, (B, Cin), dtype=jnp.float32)

    # Deterministic Linear params (PyTorch-style uniform(-1/sqrt(Cin), 1/sqrt(Cin))).
    bound = 1.0 / (Cin ** 0.5)
    w_add = jax.random.uniform(k_w1, (C, Cin), jnp.float32, -bound, bound)
    b_add = jax.random.uniform(k_b1, (C,), jnp.float32, -bound, bound)
    w_aff = jax.random.uniform(k_w2, (2 * C, Cin), jnp.float32, -bound, bound)
    b_aff = jax.random.uniform(k_b2, (2 * C,), jnp.float32, -bound, bound)

    # References first (they read x; the kernel calls below donate their copy).
    ref_add = _reference(x, noise_embed, w_add, b_add, use_affine_level=False)
    ref_aff = _reference(x, noise_embed, w_aff, b_aff, use_affine_level=True)
    jax.block_until_ready((ref_add, ref_aff))

    # Donate x so input_output_aliases actually eliminates the defensive copy.
    fwd_add = jax.jit(partial(featurewise_affine, use_affine_level=False),
                      donate_argnums=(0,))
    fwd_aff = jax.jit(partial(featurewise_affine, use_affine_level=True),
                      donate_argnums=(0,))

    out_add = fwd_add(jnp.copy(x), noise_embed, w_add, b_add)
    out_aff = fwd_aff(jnp.copy(x), noise_embed, w_aff, b_aff)
    jax.block_until_ready((out_add, out_aff))

    assert jnp.allclose(out_add, ref_add, atol=1e-5, rtol=1e-5)
    assert jnp.allclose(out_aff, ref_aff, atol=1e-5, rtol=1e-5)

    print("KERNEL_OK")
</pallas_src>

<mosaic_0001>
module attributes {stable_mosaic.version = 11 : i64} {
  func.func @_shift_kernel(%arg0: i32, %arg1: i32, %arg2: memref<8x1xf32, #tpu.memory_space<vmem>>, %arg3: memref<8x128xf32, #tpu.memory_space<vmem>>, %arg4: memref<8x128xf32, #tpu.memory_space<vmem>>) attributes {dimension_semantics = [#tpu.dimension_semantics<parallel>, #tpu.dimension_semantics<parallel>], iteration_bounds = array<i64: 1, 2>, scalar_prefetch = 0 : i64, scratch_operands = 0 : i64, tpu.core_type = #tpu.core_type<tc>, window_params = [{transform_indices = @transform_0, window_bounds = array<i64: 8, 1>}, {transform_indices = @transform_1, window_bounds = array<i64: 8, 128>}, {transform_indices = @transform_2, window_bounds = array<i64: 8, 128>}]} {
    %c0 = arith.constant 0 : index
    %c0_0 = arith.constant 0 : index
    %0 = vector.load %arg3[%c0, %c0_0] : memref<8x128xf32, #tpu.memory_space<vmem>>, vector<8x128xf32>
    %c0_1 = arith.constant 0 : index
    %c0_2 = arith.constant 0 : index
    %1 = vector.load %arg2[%c0_1, %c0_2] : memref<8x1xf32, #tpu.memory_space<vmem>>, vector<8x1xf32>
    %2 = vector.broadcast %1 : vector<8x1xf32> to vector<8x128xf32>
    %3 = arith.addf %0, %2 : vector<8x128xf32>
    %c0_3 = arith.constant 0 : index
    %c0_4 = arith.constant 0 : index
    %4 = vector.load %arg4[%c0_3, %c0_4] : memref<8x128xf32, #tpu.memory_space<vmem>>, vector<8x128xf32>
    tpu.vector_store %arg4[%c0_3, %c0_4], %3 {strides = array<i32>} : memref<8x128xf32, #tpu.memory_space<vmem>>, vector<8x128xf32>,
    return
  }
  func.func @transform_0(%arg0: i32, %arg1: i32) -> (i32, i32) {
    %c0_i32 = arith.constant 0 : i32
    %c0_i32_0 = arith.constant 0 : i32
    return %arg0, %c0_i32 : i32, i32
  }
  func.func @transform_1(%arg0: i32, %arg1: i32) -> (i32, i32) {
    %c0_i32 = arith.constant 0 : i32
    return %arg0, %arg1 : i32, i32
  }
  func.func @transform_2(%arg0: i32, %arg1: i32) -> (i32, i32) {
    %c0_i32 = arith.constant 0 : i32
    return %arg0, %arg1 : i32, i32
  }
}

</mosaic_0001>

<bundles_post_ra>
// kernel: featurewise_affine.1
= control target key start
LH: loop header
LB: loop body
LE: loop exit
PB: predicated region body
PF: predicated region fallthrough
CT: control target
= control target key end

     0   :  { %s376_s9 = smov 0   ;;  %s378_s10 = smov 0   ;;  %s400_s0 = inlined_call_operand.vmem [shape: f32[8,1], index: 0, kind: input, shape index: {}]   ;;  %s401_s1 = inlined_call_operand.vmem [shape: f32[8,256], index: 1, kind: input, shape index: {}, may-alias: {1,2}]   ;;  %s402_s2 = inlined_call_operand.vmem [shape: f32[8,256], index: 2, kind: output, shape index: {}, may-alias: {1,2}]  }
   0x1   :  { %s380_s11 = smov 0  }
   0x2 LB: > { %s21_s12 = sadd.s32 1, %s354_s10  ;;  %p305_p0 = scmp.ge.s32.totalorder %s358_s11, 1  ;;  %s358_s11 = sphi %s380_s11, %s12_s11   ;;  %s354_s10 = sphi %s378_s10, %s404_s10   ;;  %s350_s9 = sphi %s376_s9, %s403_s9  }
   0x3   : > { %p22_p1 = scmp.ge.s32.totalorder %s21_s12, 2  ;;  %p140_p2 = scmp.lt.s32.totalorder %s358_s11, 3 }
   0x5   : > { %s406_s12 = smov (%p22_p1, %s21_s12), 0  ;;  %p141_p3 = pnand %p305_p0, %p140_p2 }
   0x6   : > { %p178_p4 = scmp.lt.s32.totalorder (!%p141_p3), %s350_s9, 1 }
   0x7   : > { %144 = sbr.rel (%p141_p3) target bundleno = 141 (0x8d), region = 28 }
   0xc   : > { %v193_v0 = vld [vmem:[%s400_s0] sm:$0xff]  ;;  %v360_v1 = vmov 0   ;;  %s408_s9 = smov (!%p178_p4, %s350_s9), 1 }
   0xd   : > { %335 = vset.pattern.permute.xlu0 %v360_v1  ;;  %s306_s15 = sshll.u32 %s408_s9, 3 }
   0xe   : > { %196 = vperm.xlu0 %335, %v193_v0   ;;  %s183_s18 = scalar_lea.vmem %s401_s1, %s306_s15  ;;  %s191_s21 = scalar_lea.vmem %s402_s2, %s306_s15 }
   0xf   : > { %v192_v2 = vld [vmem:[%s183_s18] sm:$0xff] }
  0x89   : > { %v197_v3 = vpop.permute.xlu0 %196 }
  0x8a   : > { %v199_v4 = vadd.f32 %v197_v3, %v192_v2 }
  0x8c   : > { %200 = vst [vmem:[%s191_s21] sm:$0xff] %v199_v4 }
  0x8d PF: > { %s12_s11 = sadd.s32 1, %s358_s11   ;;  %s403_s9 = smov %s354_s10 }
  0x8e   : > { %p9_p5 = scmp.ge.s32.totalorder %s12_s11, 4   ;;  %s404_s10 = smov %s406_s12 }
  0x90   :  { %11 = sbr.rel (!%p9_p5) target bundleno = 2 (0x2), region = 61 }

</bundles_post_ra>
